<compile_context>
chip_gen: v6e
topology: v6e:2x2x1
jax: 0.10.0
libtpu: 0.0.40
codegen_flags: <defaults>
</compile_context>

<pallas_src>
import jax
import jax.numpy as jnp
from jax.experimental import pallas as pl
from jax.experimental.pallas import tpu as pltpu


# ----------------------------------------------------------------------------
# Pallas kernel: one batch tile -> partial sum of (oloss + nloss - 0.5*base^2)
# ----------------------------------------------------------------------------
def _triplet_loss_kernel(iv_ref, ov_ref, nv_ref, biv_ref, bov_ref, out_ref):
    inv_w = jnp.float32(1.0 / ov_ref.shape[1])

    iv = iv_ref[...].astype(jnp.float32)        # (TB, D)
    biv = biv_ref[...].astype(jnp.float32)      # (TB, D)

    # Linear pre-reduction over the window / negatives axis BEFORE dotting
    # with iv/biv (same reduction class, W / W*n_neg fewer multiplies).
    ov_sum = jnp.sum(ov_ref[...].astype(jnp.float32), axis=1)    # (TB, D)
    nv_sum = jnp.sum(nv_ref[...].astype(jnp.float32), axis=1)    # (TB, D)
    bov_sum = jnp.sum(bov_ref[...].astype(jnp.float32), axis=1)  # (TB, D)

    # oloss + nloss fused; nvectors = forward_o(nwords).neg() -> the negation
    # is folded into the minus sign (nloss == -total_sum / W).
    on = jnp.sum(iv * (ov_sum - nv_sum), axis=-1, keepdims=True) * inv_w   # (TB,1)
    base = jnp.sum(biv * bov_sum, axis=-1, keepdims=True) * inv_w          # (TB,1)

    per_b = on - 0.5 * base * base                                         # (TB,1)
    out_ref[...] = jnp.reshape(jnp.sum(per_b), (1, 1, 1))


def _pick_batch_tile(B, W, K, D, itemsize, vmem_budget=6 << 20, cap=512):
    """VMEM-budgeted batch tile: double-buffered input bytes per batch row
    across all 5 streams plus the in-body f32 working set."""
    row_bytes = D * (2 + 2 * W + K) * (2 * itemsize + 4)
    tb = vmem_budget // max(row_bytes, 1)
    tb = max(8, min(cap, (tb // 8) * 8))
    # No point exceeding the (8-rounded) batch itself.
    return min(tb, max(8, ((B + 7) // 8) * 8))


def modularity_triplet_loss_pallas(ivectors, ovectors, nvectors,
                                   base_ivectors, base_ovectors,
                                   batch_tile=None):
    """ivectors/base_ivectors: (B, D); ovectors/base_ovectors: (B, W, D);
       nvectors: (B, W*n_neg, D). Returns the scalar loss (f32)."""
    B, D = ivectors.shape
    W = ovectors.shape[1]
    K = nvectors.shape[1]
    itemsize = jnp.dtype(ivectors.dtype).itemsize

    TB = batch_tile if batch_tile is not None else _pick_batch_tile(B, W, K, D, itemsize)
    Bp = ((B + TB - 1) // TB) * TB
    # (8,128) rule applies to the last two block dims; the (TB, D) inputs need
    # TB % 8 == 0 unless the block covers the full (padded) batch extent.
    assert TB % 8 == 0 or TB == Bp, (B, TB, Bp)

    if Bp != B:
        pad = Bp - B
        # Zero-padded batch rows contribute exactly 0 to every partial sum.
        ivectors = jnp.pad(ivectors, ((0, pad), (0, 0)))
        base_ivectors = jnp.pad(base_ivectors, ((0, pad), (0, 0)))
        ovectors = jnp.pad(ovectors, ((0, pad), (0, 0), (0, 0)))
        nvectors = jnp.pad(nvectors, ((0, pad), (0, 0), (0, 0)))
        base_ovectors = jnp.pad(base_ovectors, ((0, pad), (0, 0), (0, 0)))
    nb = Bp // TB

    bytes_in = itemsize * D * Bp * (2 + 2 * W + K)
    cost = pl.CostEstimate(flops=2 * Bp * D * (2 * W + K + 2),
                           transcendentals=0,
                           bytes_accessed=bytes_in + 4 * nb)

    partials = pl.pallas_call(
        _triplet_loss_kernel,
        out_shape=jax.ShapeDtypeStruct((nb, 1, 1), jnp.float32),
        grid=(nb,),
        in_specs=[
            pl.BlockSpec((TB, D), lambda i: (i, 0)),
            pl.BlockSpec((TB, W, D), lambda i: (i, 0, 0)),
            pl.BlockSpec((TB, K, D), lambda i: (i, 0, 0)),
            pl.BlockSpec((TB, D), lambda i: (i, 0)),
            pl.BlockSpec((TB, W, D), lambda i: (i, 0, 0)),
        ],
        out_specs=pl.BlockSpec((1, 1, 1), lambda i: (i, 0, 0)),
        compiler_params=pltpu.CompilerParams(
            dimension_semantics=("parallel",),   # megacore split on v7x
        ),
        cost_estimate=cost,
    )(ivectors, ovectors, nvectors, base_ivectors, base_ovectors)

    # Tiny finalize (negate + mean over the TRUE batch) on the host-side graph.
    return -jnp.sum(partials) / jnp.float32(B)


# ----------------------------------------------------------------------------
# Minimal SGNS "model" (bf16 embedding tables -> halves HBM traffic) + wrapper.
# ----------------------------------------------------------------------------
class SGNSModel:
    def __init__(self, key, n_nodes, dim, dtype=jnp.bfloat16):
        k1, k2 = jax.random.split(key)
        self.wi = (jax.random.normal(k1, (n_nodes, dim), jnp.float32) * 0.1).astype(dtype)
        self.wo = (jax.random.normal(k2, (n_nodes, dim), jnp.float32) * 0.1).astype(dtype)

    def forward_i(self, idx):   # (B,)    -> (B, D)
        return self.wi[idx]

    def forward_o(self, idx):   # (B, W*) -> (B, W*, D)
        return self.wo[idx]


class ModularityTripletLoss:
    def __init__(self, n_neg, batch_tile=None):
        self.n_neg = n_neg
        self.batch_tile = batch_tile
        # nn.LogSigmoid from the PyTorch module is never used in forward().

    def __call__(self, model, iwords, owords, nwords, base_iwords, base_owords):
        ivectors = model.forward_i(iwords)            # (B, D)
        ovectors = model.forward_o(owords)            # (B, W, D)
        nvectors = model.forward_o(nwords)            # (B, W*n_neg, D); .neg() folded in-kernel
        base_ivectors = model.forward_i(base_iwords)  # (B, D)
        base_ovectors = model.forward_o(base_owords)  # (B, W, D)
        return modularity_triplet_loss_pallas(
            ivectors, ovectors, nvectors, base_ivectors, base_ovectors,
            batch_tile=self.batch_tile)


# ----------------------------------------------------------------------------
# Pure-JAX reference (same f32 arithmetic, original reduction order).
# ----------------------------------------------------------------------------
def _reference_loss(model, n_neg, iwords, owords, nwords, base_iwords, base_owords):
    iv = model.forward_i(iwords).astype(jnp.float32)
    ov = model.forward_o(owords).astype(jnp.float32)
    nv = -model.forward_o(nwords).astype(jnp.float32)
    biv = model.forward_i(base_iwords).astype(jnp.float32)
    bov = model.forward_o(base_owords).astype(jnp.float32)
    B, W = owords.shape
    oloss = jnp.sum(ov * iv[:, None, :], axis=-1).mean(axis=1)
    nloss = (jnp.sum(nv * iv[:, None, :], axis=-1)
             .reshape(B, W, n_neg).sum(axis=2).mean(axis=1))
    base_loss = jnp.sum(bov * biv[:, None, :], axis=-1).mean(axis=1)
    return -(oloss + nloss - 0.5 * base_loss ** 2).mean()


if __name__ == "__main__":
    key = jax.random.PRNGKey(0)
    n_nodes, dim = 64, 128          # lane-dense D
    B, W, n_neg = 16, 4, 3

    k_model, k1, k2, k3, k4, k5 = jax.random.split(key, 6)
    model = SGNSModel(k_model, n_nodes, dim)

    iwords = jax.random.randint(k1, (B,), 0, n_nodes)
    owords = jax.random.randint(k2, (B, W), 0, n_nodes)
    nwords = jax.random.randint(k3, (B, W * n_neg), 0, n_nodes)
    base_iwords = jax.random.randint(k4, (B,), 0, n_nodes)
    base_owords = jax.random.randint(k5, (B, W), 0, n_nodes)

    # batch_tile=8 -> grid of 2 steps; exercises tiling + parallel semantics.
    loss_mod = ModularityTripletLoss(n_neg, batch_tile=8)
    loss = loss_mod(model, iwords, owords, nwords, base_iwords, base_owords)
    loss = jax.block_until_ready(loss)

    ref = _reference_loss(model, n_neg, iwords, owords, nwords,
                          base_iwords, base_owords)
    assert jnp.allclose(loss, ref, atol=1e-5, rtol=1e-4), (loss, ref)
    print("KERNEL_OK")
</pallas_src>

<mosaic_0001>
module attributes {stable_mosaic.version = 11 : i64} {
  func.func @_triplet_loss_kernel(%arg0: i32, %arg1: memref<8x128xbf16, #tpu.memory_space<vmem>>, %arg2: memref<8x4x128xbf16, #tpu.memory_space<vmem>>, %arg3: memref<8x12x128xbf16, #tpu.memory_space<vmem>>, %arg4: memref<8x128xbf16, #tpu.memory_space<vmem>>, %arg5: memref<8x4x128xbf16, #tpu.memory_space<vmem>>, %arg6: memref<1x1x1xf32, #tpu.memory_space<vmem>>) attributes {dimension_semantics = [#tpu.dimension_semantics<parallel>], iteration_bounds = array<i64: 2>, scalar_prefetch = 0 : i64, scratch_operands = 0 : i64, tpu.core_type = #tpu.core_type<tc>, window_params = [{transform_indices = @transform_0, window_bounds = array<i64: 8, 128>}, {transform_indices = @transform_1, window_bounds = array<i64: 8, 4, 128>}, {transform_indices = @transform_2, window_bounds = array<i64: 8, 12, 128>}, {transform_indices = @transform_3, window_bounds = array<i64: 8, 128>}, {transform_indices = @transform_4, window_bounds = array<i64: 8, 4, 128>}, {transform_indices = @transform_5, window_bounds = array<i64: 1, 1, 1>}]} {
    %c0 = arith.constant 0 : index
    %c0_0 = arith.constant 0 : index
    %0 = vector.load %arg1[%c0, %c0_0] : memref<8x128xbf16, #tpu.memory_space<vmem>>, vector<8x128xbf16>
    %1 = arith.extf %0 : vector<8x128xbf16> to vector<8x128xf32>
    %c0_1 = arith.constant 0 : index
    %c0_2 = arith.constant 0 : index
    %2 = vector.load %arg4[%c0_1, %c0_2] : memref<8x128xbf16, #tpu.memory_space<vmem>>, vector<8x128xbf16>
    %3 = arith.extf %2 : vector<8x128xbf16> to vector<8x128xf32>
    %c0_3 = arith.constant 0 : index
    %c0_4 = arith.constant 0 : index
    %c0_5 = arith.constant 0 : index
    %4 = vector.load %arg2[%c0_3, %c0_4, %c0_5] : memref<8x4x128xbf16, #tpu.memory_space<vmem>>, vector<8x4x128xbf16>
    %5 = arith.extf %4 : vector<8x4x128xbf16> to vector<8x4x128xf32>
    %cst = arith.constant dense<0.000000e+00> : vector<8x128xf32>
    %6 = vector.multi_reduction <add>, %5, %cst [1] : vector<8x4x128xf32> to vector<8x128xf32>
    %c0_6 = arith.constant 0 : index
    %c0_7 = arith.constant 0 : index
    %c0_8 = arith.constant 0 : index
    %7 = vector.load %arg3[%c0_6, %c0_7, %c0_8] : memref<8x12x128xbf16, #tpu.memory_space<vmem>>, vector<8x12x128xbf16>
    %8 = arith.extf %7 : vector<8x12x128xbf16> to vector<8x12x128xf32>
    %cst_9 = arith.constant dense<0.000000e+00> : vector<8x128xf32>
    %9 = vector.multi_reduction <add>, %8, %cst_9 [1] : vector<8x12x128xf32> to vector<8x128xf32>
    %c0_10 = arith.constant 0 : index
    %c0_11 = arith.constant 0 : index
    %c0_12 = arith.constant 0 : index
    %10 = vector.load %arg5[%c0_10, %c0_11, %c0_12] : memref<8x4x128xbf16, #tpu.memory_space<vmem>>, vector<8x4x128xbf16>
    %11 = arith.extf %10 : vector<8x4x128xbf16> to vector<8x4x128xf32>
    %cst_13 = arith.constant dense<0.000000e+00> : vector<8x128xf32>
    %12 = vector.multi_reduction <add>, %11, %cst_13 [1] : vector<8x4x128xf32> to vector<8x128xf32>
    %13 = arith.subf %6, %9 : vector<8x128xf32>
    %14 = arith.mulf %1, %13 : vector<8x128xf32>
    %cst_14 = arith.constant dense<0.000000e+00> : vector<8xf32>
    %15 = vector.multi_reduction <add>, %14, %cst_14 [1] : vector<8x128xf32> to vector<8xf32>
    %16 = vector.shape_cast %15 : vector<8xf32> to vector<8x1xf32>
    %cst_15 = arith.constant 2.500000e-01 : f32
    %17 = vector.broadcast %cst_15 : f32 to vector<8x1xf32>
    %18 = arith.mulf %16, %17 : vector<8x1xf32>
    %19 = arith.mulf %3, %12 : vector<8x128xf32>
    %cst_16 = arith.constant dense<0.000000e+00> : vector<8xf32>
    %20 = vector.multi_reduction <add>, %19, %cst_16 [1] : vector<8x128xf32> to vector<8xf32>
    %21 = vector.shape_cast %20 : vector<8xf32> to vector<8x1xf32>
    %cst_17 = arith.constant 2.500000e-01 : f32
    %22 = vector.broadcast %cst_17 : f32 to vector<8x1xf32>
    %23 = arith.mulf %21, %22 : vector<8x1xf32>
    %cst_18 = arith.constant 5.000000e-01 : f32
    %24 = vector.broadcast %cst_18 : f32 to vector<8x1xf32>
    %25 = arith.mulf %24, %23 : vector<8x1xf32>
    %26 = arith.mulf %25, %23 : vector<8x1xf32>
    %27 = arith.subf %18, %26 : vector<8x1xf32>
    %28 = vector.shape_cast %27 : vector<8x1xf32> to vector<1x8x1xf32>
    %cst_19 = arith.constant dense<0.000000e+00> : vector<1xf32>
    %29 = vector.multi_reduction <add>, %28, %cst_19 [1, 2] : vector<1x8x1xf32> to vector<1xf32>
    %30 = vector.shape_cast %29 : vector<1xf32> to vector<1x1x1xf32>
    %31 = vector.extract %30[0, 0, 0] : f32 from vector<1x1x1xf32>
    %32 = vector.broadcast %31 : f32 to vector<1x1x1xf32>
    %c0_20 = arith.constant 0 : index
    %c0_21 = arith.constant 0 : index
    %c0_22 = arith.constant 0 : index
    %33 = vector.load %arg6[%c0_20, %c0_21, %c0_22] : memref<1x1x1xf32, #tpu.memory_space<vmem>>, vector<1x1x1xf32>
    tpu.vector_store %arg6[%c0_20, %c0_21, %c0_22], %32 {strides = array<i32>} : memref<1x1x1xf32, #tpu.memory_space<vmem>>, vector<1x1x1xf32>,
    return
  }
  func.func @transform_0(%arg0: i32) -> (i32, i32) {
    %c0_i32 = arith.constant 0 : i32
    %c0_i32_0 = arith.constant 0 : i32
    return %arg0, %c0_i32 : i32, i32
  }
  func.func @transform_1(%arg0: i32) -> (i32, i32, i32) {
    %c0_i32 = arith.constant 0 : i32
    %c0_i32_0 = arith.constant 0 : i32
    %c0_i32_1 = arith.constant 0 : i32
    return %arg0, %c0_i32, %c0_i32_0 : i32, i32, i32
  }
  func.func @transform_2(%arg0: i32) -> (i32, i32, i32) {
    %c0_i32 = arith.constant 0 : i32
    %c0_i32_0 = arith.constant 0 : i32
    %c0_i32_1 = arith.constant 0 : i32
    return %arg0, %c0_i32, %c0_i32_0 : i32, i32, i32
  }
  func.func @transform_3(%arg0: i32) -> (i32, i32) {
    %c0_i32 = arith.constant 0 : i32
    %c0_i32_0 = arith.constant 0 : i32
    return %arg0, %c0_i32 : i32, i32
  }
  func.func @transform_4(%arg0: i32) -> (i32, i32, i32) {
    %c0_i32 = arith.constant 0 : i32
    %c0_i32_0 = arith.constant 0 : i32
    %c0_i32_1 = arith.constant 0 : i32
    return %arg0, %c0_i32, %c0_i32_0 : i32, i32, i32
  }
  func.func @transform_5(%arg0: i32) -> (i32, i32, i32) {
    %c0_i32 = arith.constant 0 : i32
    %c0_i32_0 = arith.constant 0 : i32
    %c0_i32_1 = arith.constant 0 : i32
    return %arg0, %c0_i32, %c0_i32_0 : i32, i32, i32
  }
}

</mosaic_0001>

<bundles_post_ra>
// kernel: tpu_custom_call.1
= control target key start
LH: loop header
LB: loop body
LE: loop exit
PB: predicated region body
PF: predicated region fallthrough
CT: control target
= control target key end

     0   :  { %s781_s18 = smov 0   ;;  %s930_s0 = inlined_call_operand.vmem [shape: bf16[16,128], index: 0, kind: input, shape index: {}]   ;;  %s931_s1 = inlined_call_operand.vmem [shape: bf16[16,4,128], index: 1, kind: input, shape index: {}]   ;;  %s932_s2 = inlined_call_operand.vmem [shape: bf16[16,12,128], index: 2, kind: input, shape index: {}]   ;;  %s933_s3 = inlined_call_operand.vmem [shape: bf16[16,128], index: 3, kind: input, shape index: {}]   ;;  %s934_s4 = inlined_call_operand.vmem [shape: bf16[16,4,128], index: 4, kind: input, shape index: {}]   ;;  %s935_s5 = inlined_call_operand.vmem [shape: f32[2,1,1], index: 5, kind: output, shape index: {}]  }
   0x1 LB: > { %s787_s19 = sadd.s32 4294967295, %s749_s18   ;;  %p720_p0 = scmp.ge.s32.totalorder %s749_s18, 1  ;;  %s749_s18 = sphi %s781_s18, %s15_s18  }
   0x2   : > { %p229_p1 = scmp.lt.s32.totalorder %s749_s18, 3 }
   0x4   : > { %p230_p2 = pnand %p720_p0, %p229_p1 }
   0x5   : > { %s722_s20 = sshll.u32 (!%p230_p2), %s787_s19, 3  ;;  %p274_p4 = scmp.lt.s32.totalorder (!%p230_p2), %s787_s19, 1 }
   0x6   : > { %233 = sbr.rel (%p230_p2) target bundleno = 425 (0x1a9), region = 40  ;;  %p279_p3 = scmp.lt.s32.totalorder (!%p230_p2), %s722_s20, 15 }
   0xb   : > { %s937_s20 = smov (!%p279_p3, %s722_s20), 15  ;;  %vm324_vm0 = vcmask 1043456   ;;  %s939_s19 = smov (!%p274_p4, %s787_s19), 1  ;;  %vm565_vm1 = vcmask 1041409   ;;  %vm567_vm2 = vcmask 1042434   ;;  %vm569_vm3 = vcmask 1043459  }
   0xc   : > { %s723_s21 = sshll.u32 %s937_s20, 1  ;;  %s721_s28 = sshll.u32 %s939_s19, 2  ;;  %vm571_vm4 = vcmask 1044484   ;;  %vm573_vm5 = vcmask 1045509   ;;  %vm575_vm6 = vcmask 1046534   ;;  %vm577_vm7 = vcmask 1047559  }
   0xd   : > { %s799_s24 = scalar_lea.vmem %s931_s1, %s723_s21  ;;  %s299_s27 = scalar_lea.vmem %s934_s4, %s723_s21  ;;  %vm607_vm8 = vcmask 7168   ;;  %vm619_vm9 = vcmask 0  }
   0xe   : > { %v805_v0 = vld [vmem:[%s799_s24] sm:$0x3]  ;;  %v808_v1 = vld [vmem:[%s799_s24 + $0x2] sm:$0x3]  ;;  %v811_v2 = vld [vmem:[%s799_s24 + $0x4] sm:$0x3]  ;;  %s294_s6 = scalar_lea.vmem %s933_s3, %s721_s28  ;;  %s277_s13 = scalar_lea.vmem %s930_s0, %s721_s28 }
   0xf   : > { %v477_v3 = vld [vmem:[%s299_s27] sm:$0x3]  ;;  %v478_v4 = vld [vmem:[%s299_s27 + $0x2] sm:$0x3]  ;;  %v479_v5 = vld [vmem:[%s299_s27 + $0x4] sm:$0x3]  ;;  %v316_v10 = vunpack.c.l.bf16 %v805_v0  ;;  %v317_v11 = vunpack.c.l.bf16 %v808_v1  ;;  %v318_v18 = vunpack.c.l.bf16 %v811_v2  ;;  %s303_s16 = scalar_lea.vmem %s935_s5, %s939_s19 }
  0x10   : > { %v480_v6 = vld [vmem:[%s299_s27 + $0x6] sm:$0x3]  ;;  %v481_v7 = vld [vmem:[%s299_s27 + $0x8] sm:$0x3]  ;;  %v485_v8 = vunpack.c.l.bf16 %v477_v3  ;;  %v486_v9 = vunpack.c.l.bf16 %v478_v4  ;;  %v482_v12 = vld [vmem:[%s299_s27 + $0xa] sm:$0x3]  ;;  %v487_v15 = vunpack.c.l.bf16 %v479_v5 }
  0x11   : > { %v483_v13 = vld [vmem:[%s299_s27 + $0xc] sm:$0x3]  ;;  %v484_v14 = vld [vmem:[%s299_s27 + $0xe] sm:$0x3]  ;;  %v488_v16 = vunpack.c.l.bf16 %v480_v6  ;;  %v489_v17 = vunpack.c.l.bf16 %v481_v7  ;;  %v490_v19 = vunpack.c.l.bf16 %v482_v12  ;;  %v306_v59 = vld [vmem:[%s294_s6] sm:$0xf] }
  0x12   : > { %v491_v20 = vunpack.c.l.bf16 %v483_v13  ;;  %v492_v21 = vunpack.c.l.bf16 %v484_v14  ;;  %v493_v22 = vsel %vm324_vm0, %v485_v8, 0.0  ;;  %v500_v24 = vsel %vm324_vm0, %v486_v9, 0.0  ;;  %v311_v7 = vld [vmem:[%s799_s24 + $0x6] sm:$0x3]  ;;  %v312_v8 = vld [vmem:[%s799_s24 + $0x8] sm:$0x3] }
  0x13   : > { %v494_v23 = vrot.slane %v493_v22, 4  ;;  %v507_v25 = vsel %vm324_vm0, %v487_v15, 0.0  ;;  %v514_v26 = vsel %vm324_vm0, %v488_v16, 0.0  ;;  %v501_v27 = vrot.slane %v500_v24, 4  ;;  %v313_v15 = vld [vmem:[%s799_s24 + $0xa] sm:$0x3] }
  0x14   : > { %v508_v28 = vrot.slane %v507_v25, 4  ;;  %v515_v29 = vrot.slane %v514_v26, 4  ;;  %v521_v30 = vsel %vm324_vm0, %v489_v17, 0.0  ;;  %v528_v33 = vsel %vm324_vm0, %v490_v19, 0.0  ;;  %s732_s7 = sshll.u32 %s937_s20, 3 }
  0x15   : > { %v495_v31 = vadd.f32 %v494_v23, %v493_v22  ;;  %v522_v32 = vrot.slane %v521_v30, 4  ;;  %v535_v34 = vsel %vm324_vm0, %v491_v20, 0.0  ;;  %v502_v35 = vadd.f32 %v501_v27, %v500_v24  ;;  %v315_v22 = vld [vmem:[%s799_s24 + $0xe] sm:$0x3]  ;;  %s864_s10 = scalar_lea.vmem %s932_s2, %s732_s7 }
  0x16   : > { %v509_v36 = vadd.f32 %v508_v28, %v507_v25  ;;  %v516_v37 = vadd.f32 %v515_v29, %v514_v26  ;;  %v529_v38 = vrot.slane %v528_v33, 4  ;;  %v536_v41 = vrot.slane %v535_v34, 4 }
  0x17   : > { %v496_v39 = vrot.slane %v495_v31, 2  ;;  %v523_v40 = vadd.f32 %v522_v32, %v521_v30  ;;  %v542_v42 = vsel %vm324_vm0, %v492_v21, 0.0  ;;  %v503_v43 = vrot.slane %v502_v35, 2  ;;  %v314_v21 = vld [vmem:[%s799_s24 + $0xc] sm:$0x3] }
  0x18   : > { %v510_v44 = vrot.slane %v509_v36, 2  ;;  %v517_v45 = vrot.slane %v516_v37, 2  ;;  %v530_v46 = vadd.f32 %v529_v38, %v528_v33  ;;  %v537_v49 = vadd.f32 %v536_v41, %v535_v34 }
  0x19   : > { %v497_v47 = vadd.f32 %v496_v39, %v495_v31  ;;  %v524_v48 = vrot.slane %v523_v40, 2  ;;  %v543_v50 = vrot.slane %v542_v42, 4  ;;  %v504_v51 = vadd.f32 %v503_v43, %v502_v35 }
  0x1a   : > { %v511_v52 = vadd.f32 %v510_v44, %v509_v36  ;;  %v518_v53 = vadd.f32 %v517_v45, %v516_v37  ;;  %v531_v54 = vrot.slane %v530_v46, 2  ;;  %v538_v57 = vrot.slane %v537_v49, 2 }
  0x1b   : > { %v498_v55 = vrot.slane %v497_v47, 1  ;;  %v525_v56 = vadd.f32 %v524_v48, %v523_v40  ;;  %v544_v58 = vadd.f32 %v543_v50, %v542_v42  ;;  %v505_v60 = vrot.slane %v504_v51, 1 }
  0x1c   : > { %v512_v61 = vrot.slane %v511_v52, 1  ;;  %v519_v62 = vrot.slane %v518_v53, 1  ;;  %v532_v63 = vadd.f32 %v531_v54, %v530_v46  ;;  %v539_v5 = vadd.f32 %v538_v57, %v537_v49 }
  0x1d   : > { %v499_v3 = vadd.f32 %v498_v55, %v497_v47  ;;  %v526_v4 = vrot.slane %v525_v56, 1  ;;  %v545_v6 = vrot.slane %v544_v58, 2  ;;  %v506_v9 = vadd.f32 %v505_v60, %v504_v51 }
  0x1e   : > { %v513_v12 = vadd.f32 %v512_v61, %v511_v52  ;;  %v520_v13 = vadd.f32 %v519_v62, %v518_v53  ;;  %v533_v14 = vrot.slane %v532_v63, 1  ;;  %v307_v16 = vunpack.c.l.bf16 %v306_v59 }
  0x1f   : > { %v527_v17 = vadd.f32 %v526_v4, %v525_v56  ;;  %v540_v19 = vrot.slane %v539_v5, 1  ;;  %v546_v20 = vadd.f32 %v545_v6, %v544_v58  ;;  %v592_v24 = vsel %vm565_vm1, %v506_v9, %v499_v3 }
  0x20   : > { %v534_v23 = vadd.f32 %v533_v14, %v532_v63  ;;  %v319_v25 = vunpack.c.l.bf16 %v311_v7  ;;  %v320_v26 = vunpack.c.l.bf16 %v312_v8  ;;  %v593_v29 = vsel %vm567_vm2, %v513_v12, %v592_v24  ;;  %v381_v8 = vld [vmem:[%s864_s10] ss:$8 sps:$4 sm:$0xff]  }
  0x21   : > { %v541_v27 = vadd.f32 %v540_v19, %v539_v5  ;;  %v547_v28 = vrot.slane %v546_v20, 1  ;;  %v321_v30 = vunpack.c.l.bf16 %v313_v15  ;;  %v594_v31 = vsel %vm569_vm3, %v520_v13, %v593_v29  ;;  %v382_v15 = vld [vmem:[%s864_s10 + $0x4] sm:$0x3] }
  0x22   : > { %v322_v32 = vunpack.c.l.bf16 %v314_v21  ;;  %v323_v33 = vunpack.c.l.bf16 %v315_v22  ;;  %v325_v34 = vsel %vm324_vm0, %v316_v10, 0.0  ;;  %v595_v36 = vsel %vm571_vm4, %v527_v17, %v594_v31  ;;  %v384_v21 = vld [vmem:[%s864_s10 + $0xc] sm:$0x3]  ;;  %v385_v22 = vld [vmem:[%s864_s10 + $0x10] ss:$8 sps:$4 sm:$0xff]  }
  0x23   : > { %v548_v35 = vadd.f32 %v547_v28, %v546_v20  ;;  %v326_v37 = vrot.slane %v325_v34, 4  ;;  %v332_v38 = vsel %vm324_vm0, %v317_v11, 0.0  ;;  %v596_v39 = vsel %vm573_vm5, %v534_v23, %v595_v36  ;;  %v392_v36 = vld [vmem:[%s864_s10 + $0x2c] sm:$0x3] }
  0x24   : > { %v333_v40 = vrot.slane %v332_v38, 4  ;;  %v339_v41 = vsel %vm324_vm0, %v318_v18, 0.0  ;;  %v346_v42 = vsel %vm324_vm0, %v319_v25, 0.0  ;;  %v597_v0 = vsel %vm575_vm6, %v541_v27, %v596_v39  ;;  %v388_v27 = vld [vmem:[%s864_s10 + $0x1c] sm:$0x3] }
  0x25   : > { %v327_v10 = vadd.f32 %v326_v37, %v325_v34  ;;  %v340_v43 = vrot.slane %v339_v41, 4  ;;  %v347_v44 = vrot.slane %v346_v42, 4  ;;  %v598_v45 = vsel %vm577_vm7, %v548_v35, %v597_v0  ;;  %v390_v35 = vld [vmem:[%s864_s10 + $0x24] sm:$0x3]  ;;  %v393_v0 = vld [vmem:[%s864_s10 + $0x30] ss:$8 sps:$4 sm:$0xff]  }
  0x26   : > { %v334_v1 = vadd.f32 %v333_v40, %v332_v38  ;;  %v353_v11 = vsel %vm324_vm0, %v320_v26, 0.0  ;;  %v360_v46 = vsel %vm324_vm0, %v321_v30, 0.0  ;;  %v600_v47 = vmul.f32 %v598_v45, %v307_v16  ;;  %v386_v26 = vld [vmem:[%s864_s10 + $0x14] sm:$0x3] }
  0x27   : > { %v328_v48 = vrot.slane %v327_v10, 2  ;;  %v341_v2 = vadd.f32 %v340_v43, %v339_v41  ;;  %v348_v49 = vadd.f32 %v347_v44, %v346_v42  ;;  %v354_v50 = vrot.slane %v353_v11, 4  ;;  %v396_v43 = vld [vmem:[%s864_s10 + $0x3c] sm:$0x3] }
  0x28   : > { %v335_v18 = vrot.slane %v334_v1, 2  ;;  %v361_v51 = vrot.slane %v360_v46, 4  ;;  %v367_v52 = vsel %vm324_vm0, %v322_v32, 0.0  ;;  %601 = vadd.xlane.f32.xlu0 %v600_v47  ;;  %v374_v60 = vsel %vm324_vm0, %v323_v33, 0.0  ;;  %v389_v32 = vld [vmem:[%s864_s10 + $0x20] ss:$8 sps:$4 sm:$0xff]  }
  0x29   : > { %v329_v53 = vadd.f32 %v328_v48, %v327_v10  ;;  %v342_v54 = vrot.slane %v341_v2, 2  ;;  %v349_v55 = vrot.slane %v348_v49, 2  ;;  %v368_v56 = vrot.slane %v367_v52, 4  ;;  %v394_v10 = vld [vmem:[%s864_s10 + $0x34] sm:$0x3] }
  0x2a   : > { %v336_v57 = vadd.f32 %v335_v18, %v334_v1  ;;  %v355_v58 = vadd.f32 %v354_v50, %v353_v11  ;;  %v362_v59 = vadd.f32 %v361_v51, %v360_v46  ;;  %v375_v7 = vrot.slane %v374_v60, 4 }
  0x2b   : > { %v330_v61 = vrot.slane %v329_v53, 1  ;;  %v343_v62 = vadd.f32 %v342_v54, %v341_v2  ;;  %v350_v63 = vadd.f32 %v349_v55, %v348_v49  ;;  %v369_v3 = vadd.f32 %v368_v56, %v367_v52 }
  0x2c   : > { %v337_v4 = vrot.slane %v336_v57, 1  ;;  %v356_v5 = vrot.slane %v355_v58, 2  ;;  %v363_v6 = vrot.slane %v362_v59, 2  ;;  %v376_v20 = vadd.f32 %v375_v7, %v374_v60 }
  0x2d   : > { %v868_v9 = vadd.f32 %v330_v61, %v329_v53  ;;  %v344_v12 = vrot.slane %v343_v62, 1  ;;  %v351_v13 = vrot.slane %v350_v63, 1  ;;  %v370_v14 = vrot.slane %v369_v3, 2 }
  0x2e   : > { %v871_v16 = vadd.f32 %v337_v4, %v336_v57  ;;  %v357_v17 = vadd.f32 %v356_v5, %v355_v58  ;;  %v364_v19 = vadd.f32 %v363_v6, %v362_v59  ;;  %v397_v28 = vunpack.c.l.bf16 %v381_v8 }
  0x2f   : > { %v875_v23 = vadd.f32 %v344_v12, %v343_v62  ;;  %v877_v24 = vadd.f32 %v351_v13, %v350_v63  ;;  %v371_v25 = vadd.f32 %v370_v14, %v369_v3  ;;  %v377_v31 = vrot.slane %v376_v20, 2 }
  0x30   : > { %v358_v29 = vrot.slane %v357_v17, 1  ;;  %v365_v30 = vrot.slane %v364_v19, 1  ;;  %v398_v33 = vunpack.c.l.bf16 %v382_v15  ;;  %v399_v37 = vunpack.c.h.bf16 %v381_v8 }
  0x31   : > { %v372_v34 = vrot.slane %v371_v25, 1  ;;  %v400_v38 = vunpack.c.l.bf16 %v384_v21  ;;  %v401_v39 = vunpack.c.l.bf16 %v385_v22  ;;  %v378_v42 = vadd.f32 %v377_v31, %v376_v20 }
  0x32   : > { %v884_v40 = vadd.f32 %v358_v29, %v357_v17  ;;  %v886_v41 = vadd.f32 %v365_v30, %v364_v19  ;;  %v402_v44 = vunpack.c.l.bf16 %v386_v26  ;;  %v403_v1 = vunpack.c.h.bf16 %v385_v22 }
  0x33   : > { %v891_v45 = vadd.f32 %v372_v34, %v371_v25  ;;  %v404_v11 = vunpack.c.l.bf16 %v388_v27  ;;  %v405_v46 = vunpack.c.l.bf16 %v389_v32  ;;  %v379_v47 = vrot.slane %v378_v42, 1 }
  0x34   : > { %v406_v48 = vunpack.c.l.bf16 %v390_v35  ;;  %v407_v2 = vunpack.c.h.bf16 %v389_v32  ;;  %v408_v49 = vunpack.c.l.bf16 %v392_v36  ;;  %v409_v18 = vunpack.c.l.bf16 %v393_v0 }
  0x35   : > { %v410_v50 = vunpack.c.l.bf16 %v394_v10  ;;  %v411_v51 = vunpack.c.h.bf16 %v393_v0  ;;  %v412_v52 = vunpack.c.l.bf16 %v396_v43  ;;  %v893_v53 = vadd.f32 %v379_v47, %v378_v42 }
  0x36   : > { %v413_v54 = vsel %vm324_vm0, %v398_v33, 0.0  ;;  %v421_v55 = vsel %vm324_vm0, %v400_v38, 0.0  ;;  %v429_v56 = vsel %vm324_vm0, %v402_v44, 0.0  ;;  %v437_v60 = vsel %vm324_vm0, %v404_v11, 0.0 }
  0x37   : > { %v414_v57 = vadd.f32 %v413_v54, %v397_v28  ;;  %v422_v58 = vadd.f32 %v421_v55, %v399_v37  ;;  %v430_v59 = vadd.f32 %v429_v56, %v401_v39  ;;  %v438_v61 = vadd.f32 %v437_v60, %v403_v1 }
  0x38   : > { %v445_v62 = vsel %vm324_vm0, %v406_v48, 0.0  ;;  %v453_v63 = vsel %vm324_vm0, %v408_v49, 0.0  ;;  %v461_v3 = vsel %vm324_vm0, %v410_v50, 0.0  ;;  %v469_v14 = vsel %vm324_vm0, %v412_v52, 0.0 }
  0x39   : > { %v415_v4 = vrot.slane %v414_v57, 4  ;;  %v423_v5 = vrot.slane %v422_v58, 4  ;;  %v431_v6 = vrot.slane %v430_v59, 4  ;;  %v446_v7 = vadd.f32 %v445_v62, %v405_v46 }
  0x3a   : > { %v439_v8 = vrot.slane %v438_v61, 4  ;;  %v454_v12 = vadd.f32 %v453_v63, %v407_v2  ;;  %v462_v13 = vadd.f32 %v461_v3, %v409_v18  ;;  %v470_v26 = vadd.f32 %v469_v14, %v411_v51 }
  0x3b   : > { %v416_v15 = vadd.f32 %v415_v4, %v414_v57  ;;  %v424_v17 = vadd.f32 %v423_v5, %v422_v58  ;;  %v432_v19 = vadd.f32 %v431_v6, %v430_v59  ;;  %v447_v20 = vrot.slane %v446_v7, 4  ;;  %v304_v4 = vld [vmem:[%s277_s13] sm:$0xf] }
  0x3c   : > { %v440_v21 = vadd.f32 %v439_v8, %v438_v61  ;;  %v455_v22 = vrot.slane %v454_v12, 4  ;;  %v463_v25 = vrot.slane %v462_v13, 4  ;;  %v471_v34 = vrot.slane %v470_v26, 4 }
  0x3d   : > { %v417_v27 = vrot.slane %v416_v15, 2  ;;  %v425_v28 = vrot.slane %v424_v17, 2  ;;  %v433_v29 = vrot.slane %v432_v19, 2  ;;  %v448_v30 = vadd.f32 %v447_v20, %v446_v7 }
  0x3e   : > { %v441_v31 = vrot.slane %v440_v21, 2  ;;  %v456_v32 = vadd.f32 %v455_v22, %v454_v12  ;;  %v464_v33 = vadd.f32 %v463_v25, %v462_v13  ;;  %v472_v10 = vadd.f32 %v471_v34, %v470_v26 }
  0x3f   : > { %v418_v35 = vadd.f32 %v417_v27, %v416_v15  ;;  %v426_v36 = vadd.f32 %v425_v28, %v424_v17  ;;  %v434_v37 = vadd.f32 %v433_v29, %v432_v19  ;;  %v449_v38 = vrot.slane %v448_v30, 2 }
  0x40   : > { %v442_v39 = vadd.f32 %v441_v31, %v440_v21  ;;  %v457_v42 = vrot.slane %v456_v32, 2  ;;  %v465_v0 = vrot.slane %v464_v33, 2  ;;  %v473_v2 = vrot.slane %v472_v10, 2 }
  0x41   : > { %v419_v43 = vrot.slane %v418_v35, 1  ;;  %v427_v44 = vrot.slane %v426_v36, 1  ;;  %v435_v1 = vrot.slane %v434_v37, 1  ;;  %v450_v11 = vadd.f32 %v449_v38, %v448_v30 }
  0x42   : > { %v443_v46 = vrot.slane %v442_v39, 1  ;;  %v458_v47 = vadd.f32 %v457_v42, %v456_v32  ;;  %v466_v48 = vadd.f32 %v465_v0, %v464_v33  ;;  %v474_v56 = vadd.f32 %v473_v2, %v472_v10 }
  0x43   : > { %v420_v49 = vadd.f32 %v419_v43, %v418_v35  ;;  %v428_v18 = vadd.f32 %v427_v44, %v426_v36  ;;  %v436_v50 = vadd.f32 %v435_v1, %v434_v37  ;;  %v451_v51 = vrot.slane %v450_v11, 1 }
  0x44   : > { %v444_v52 = vadd.f32 %v443_v46, %v442_v39  ;;  %v459_v54 = vrot.slane %v458_v47, 1  ;;  %v467_v55 = vrot.slane %v466_v48, 1  ;;  %v475_v63 = vrot.slane %v474_v56, 1 }
  0x45   : > { %v452_v57 = vadd.f32 %v451_v51, %v450_v11  ;;  %v549_v58 = vsub.f32 %v868_v9, %v420_v49  ;;  %v550_v59 = vsub.f32 %v871_v16, %v428_v18  ;;  %v551_v60 = vsub.f32 %v875_v23, %v436_v50 }
  0x46   : > { %v460_v61 = vadd.f32 %v459_v54, %v458_v47  ;;  %v468_v62 = vadd.f32 %v467_v55, %v466_v48  ;;  %v552_v3 = vsub.f32 %v877_v24, %v444_v52  ;;  %v476_v7 = vadd.f32 %v475_v63, %v474_v56 }
  0x47   : > { %v553_v5 = vsub.f32 %v884_v40, %v452_v57  ;;  %v566_v6 = vsel %vm565_vm1, %v550_v59, %v549_v58  ;;  %v305_v23 = vunpack.c.l.bf16 %v304_v4 }
  0x48   : > { %v554_v8 = vsub.f32 %v886_v41, %v460_v61  ;;  %v555_v12 = vsub.f32 %v891_v45, %v468_v62  ;;  %v568_v9 = vsel %vm567_vm2, %v551_v60, %v566_v6  ;;  %v556_v13 = vsub.f32 %v893_v53, %v476_v7 }
  0x49   : > { %v570_v16 = vsel %vm569_vm3, %v552_v3, %v568_v9 }
  0x4a   : > { %v572_v14 = vsel %vm571_vm4, %v553_v5, %v570_v16 }
  0x4b   : > { %v574_v24 = vsel %vm573_vm5, %v554_v8, %v572_v14 }
  0x4c   : > { %v576_v40 = vsel %vm575_vm6, %v555_v12, %v574_v24 }
  0x4d   : > { %v578_v15 = vsel %vm577_vm7, %v556_v13, %v576_v40 }
  0x4e   : > { %v580_v17 = vmul.f32 %v578_v15, %v305_v23 }
  0x50   : > { %581 = vadd.xlane.f32.xlu0 %v580_v17 }
  0xb1   : > { %v602_v41 = vpop.xlane.xlu0 %601 }
  0xb2   : > { %v603_v19 = vmul.f32 0.25, %v602_v41 }
  0xb4   : > { %v604_v45 = vmul.f32 0.5, %v603_v19 }
  0xb6   : > { %v605_v20 = vmul.f32 %v604_v45, %v603_v19 }
  0xd9   : > { %v582_v21 = vpop.xlane.xlu0 %581 }
  0xda   : > { %v583_v22 = vmul.f32 0.25, %v582_v21 }
  0xdc   : > { %v606_v25 = vsub.f32 %v583_v22, %v605_v20 }
  0xde   : > { %v608_v53 = vsel %vm607_vm8, %v606_v25, 0.0 }
  0xdf   : > { %609 = vadd.xlane.f32.xlu1 %v608_v53 }
 0x168   : > { %v610_v26 = vpop.xlane.xlu1 %609 }
 0x169   : > { %v611_v27 = vrot.slane %v610_v26, 4 }
 0x16b   : > { %v612_v28 = vadd.f32 %v611_v27, %v610_v26 }
 0x16d   : > { %v613_v29 = vrot.slane %v612_v28, 2 }
 0x16f   : > { %v614_v30 = vadd.f32 %v613_v29, %v612_v28 }
 0x171   : > { %v615_v31 = vrot.slane %v614_v30, 1 }
 0x173   : > { %v616_v32 = vadd.f32 %v615_v31, %v614_v30 }
 0x175   : > { %733 = vpush %v616_v32 }
 0x1a6   : > { %s734_s17 = spop %733 }
 0x1a7   : > { %v618_v33 = vstv %s734_s17 }
 0x1a8   : > { %620 = vst.msk [vmem:[%s303_s16] sm:$0x1] %vm619_vm9, %v618_v33 }
 0x1a9 PF: > { %s15_s18 = sadd.s32 1, %s749_s18  }
 0x1aa   : > { %p12_p5 = scmp.ge.s32.totalorder %s15_s18, 4  }
 0x1ac   :  { %14 = sbr.rel (!%p12_p5) target bundleno = 1 (0x1), region = 82 }

</bundles_post_ra>
